<compile_context>
chip_gen: v6e
topology: v6e:2x2x1
jax: 0.10.0
libtpu: 0.0.40
codegen_flags: <defaults>
</compile_context>

<pallas_src>
import jax
import jax.numpy as jnp
from jax import lax
from jax.experimental import pallas as pl
from jax.experimental.pallas import tpu as pltpu


def _pick_tile_h(H: int, W: int) -> int:
    """Pick an output-row tile: divides H, gives a lane-dense (multiple of 128)
    flattened spatial block (or covers the whole image), prefers >=2 h-tiles for
    pipelining / megacore, and keeps the per-tile matmul modest."""
    divs = [t for t in range(1, H + 1) if H % t == 0]
    valid = [t for t in divs if (t * W) % 128 == 0 or t == H]
    preferred = [t for t in valid if H // t >= 2 and t * W <= 512]
    if preferred:
        return max(preferred)
    small = [t for t in valid if t * W <= 512]
    if small:
        return max(small)
    return min(valid)  # t == H is always valid


def _make_conv3x3_kernel(tile_h: int, out_w: int):
    """Kernel closure over static tile geometry.

    Refs:
      x_ref: (1, Cin, H+2, W+2)   padded image (resident across h-tiles)
      w_ref: (Cout, 9*Cin)        taps flattened in (dy, dx, cin) order
      b_ref: (Cout, 1)
      o_ref: (1, Cout, tile_h*W)  one spatial tile of flattened NCHW output
    """

    def kernel(x_ref, w_ref, b_ref, o_ref):
        h = pl.program_id(1)
        cin = x_ref.shape[1]

        row_start = h * tile_h
        if tile_h % 8 == 0:
            row_start = pl.multiple_of(row_start, 8)

        # (Cin, tile_h+2, W+2) window; the +1 halo comes from the wrapper pad.
        xt = x_ref[0, :, pl.ds(row_start, tile_h + 2), :]

        # im2col: stack the 9 shifted taps along the contraction axis so the
        # whole 3x3 conv is ONE MXU matmul per tile (K = 9*Cin).
        taps = []
        for dy in range(3):
            for dx in range(3):
                tap = xt[:, dy:dy + tile_h, dx:dx + out_w]      # (Cin, th, W)
                taps.append(tap.reshape(cin, tile_h * out_w))
        slab = jnp.concatenate(taps, axis=0)                    # (9*Cin, th*W)

        # (Cout, 9*Cin) @ (9*Cin, th*W) -> (Cout, th*W), f32 accumulation.
        acc = jnp.dot(w_ref[...], slab, preferred_element_type=jnp.float32)
        acc = acc + b_ref[...].astype(jnp.float32)              # bias broadcast
        acc = jnp.where(acc > 0, acc, 0.2 * acc)                # LeakyReLU(0.2)

        # Lane-dense (th*W is a multiple of 128), already NCHW-ordered store.
        o_ref[0] = acc.astype(o_ref.dtype)

    return kernel


def conv3x3_leaky_relu(x_nchw, weight, bias, *, tile_h=None):
    """x_nchw: (N, Cin, H, W); weight: (Cout, Cin, 3, 3); bias: (Cout,).

    Returns (N, Cout, H, W), matching
    nn.Sequential(nn.Conv2d(Cin, Cout, 3, stride=1, padding=1, bias=True),
                  nn.LeakyReLU(0.2)).
    """
    N, Cin, H, W = x_nchw.shape
    Cout = weight.shape[0]

    if tile_h is None:
        tile_h = _pick_tile_h(H, W)
    assert H % tile_h == 0
    n_h = H // tile_h

    # Only remaining glue: zero-pad the spatial halo. No layout transposes.
    x_pad = jnp.pad(x_nchw, ((0, 0), (0, 0), (1, 1), (1, 1)))

    # (Cout, Cin, 3, 3) -> (Cout, 3, 3, Cin) -> (Cout, 9*Cin); column order
    # (dy, dx, cin) matches the kernel's im2col row order.
    w2d = jnp.transpose(weight, (0, 2, 3, 1)).reshape(Cout, 9 * Cin)
    b2d = bias.reshape(Cout, 1)

    flops = 2 * N * H * W * 9 * Cin * Cout + 3 * N * H * W * Cout
    bytes_accessed = (x_pad.size * x_pad.dtype.itemsize
                      + w2d.size * w2d.dtype.itemsize
                      + b2d.size * b2d.dtype.itemsize
                      + N * Cout * H * W * x_nchw.dtype.itemsize)

    out_flat = pl.pallas_call(
        _make_conv3x3_kernel(tile_h, W),
        out_shape=jax.ShapeDtypeStruct((N, Cout, H * W), x_nchw.dtype),
        grid_spec=pltpu.PrefetchScalarGridSpec(
            num_scalar_prefetch=0,
            grid=(N, n_h),
            in_specs=[
                # Full padded image per batch element; index map ignores h, so
                # it is fetched once per n and stays resident across h-tiles.
                pl.BlockSpec((1, Cin, H + 2, W + 2), lambda n, h: (n, 0, 0, 0)),
                pl.BlockSpec((Cout, 9 * Cin), lambda n, h: (0, 0)),
                pl.BlockSpec((Cout, 1), lambda n, h: (0, 0)),
            ],
            out_specs=pl.BlockSpec((1, Cout, tile_h * W),
                                   lambda n, h: (n, 0, h)),
        ),
        compiler_params=pltpu.CompilerParams(
            dimension_semantics=("parallel", "parallel")),
        cost_estimate=pl.CostEstimate(
            flops=flops, transcendentals=0, bytes_accessed=bytes_accessed),
    )(x_pad, w2d, b2d)

    # (N, Cout, H*W) is already flattened NCHW -> free reshape, no transpose.
    return out_flat.reshape(N, Cout, H, W)


def _reference(x_nchw, weight, bias):
    y = lax.conv_general_dilated(
        x_nchw, weight,
        window_strides=(1, 1),
        padding=((1, 1), (1, 1)),
        dimension_numbers=("NCHW", "OIHW", "NCHW"),
    ) + bias.reshape(1, -1, 1, 1)
    return jnp.where(y > 0, y, 0.2 * y)


if __name__ == "__main__":
    key = jax.random.PRNGKey(0)
    k_x, k_w, k_b = jax.random.split(key, 3)

    N, Cin, Cout, H, W = 2, 4, 8, 16, 16

    x = jax.random.normal(k_x, (N, Cin, H, W), dtype=jnp.float32)
    # Deterministic synthetic params (PyTorch Conv2d shapes).
    fan_in = Cin * 3 * 3
    bound = 1.0 / (fan_in ** 0.5)
    weight = jax.random.uniform(k_w, (Cout, Cin, 3, 3), jnp.float32,
                                minval=-bound, maxval=bound)
    bias = jax.random.uniform(k_b, (Cout,), jnp.float32,
                              minval=-bound, maxval=bound)

    out = conv3x3_leaky_relu(x, weight, bias)
    out = jax.block_until_ready(out)

    ref = _reference(x, weight, bias)
    assert out.shape == (N, Cout, H, W)
    assert jnp.allclose(out, ref, atol=1e-5, rtol=1e-5), "mismatch vs reference"

    print("KERNEL_OK")
</pallas_src>

<mosaic_0001>
module attributes {stable_mosaic.version = 11 : i64} {
  func.func @kernel(%arg0: i32, %arg1: i32, %arg2: memref<1x4x18x18xf32, #tpu.memory_space<vmem>>, %arg3: memref<8x36xf32, #tpu.memory_space<vmem>>, %arg4: memref<8x1xf32, #tpu.memory_space<vmem>>, %arg5: memref<1x8x128xf32, #tpu.memory_space<vmem>>) attributes {dimension_semantics = [#tpu.dimension_semantics<parallel>, #tpu.dimension_semantics<parallel>], iteration_bounds = array<i64: 2, 2>, scalar_prefetch = 0 : i64, scratch_operands = 0 : i64, tpu.core_type = #tpu.core_type<tc>, window_params = [{transform_indices = @transform_0, window_bounds = array<i64: 1, 4, 18, 18>}, {pipeline_mode = #tpu.pipeline_mode<synchronous>, transform_indices = @transform_1, window_bounds = array<i64: 8, 36>}, {pipeline_mode = #tpu.pipeline_mode<synchronous>, transform_indices = @transform_2, window_bounds = array<i64: 8, 1>}, {transform_indices = @transform_3, window_bounds = array<i64: 1, 8, 128>}]} {
    %c8_i32 = arith.constant 8 : i32
    %0 = arith.muli %arg1, %c8_i32 : i32
    %1 = tpu.assume_multiple %0, 8 : i32
    %c0 = arith.constant 0 : index
    %c0_0 = arith.constant 0 : index
    %2 = arith.index_cast %1 : i32 to index
    %c0_1 = arith.constant 0 : index
    %3 = vector.load %arg2[%c0, %c0_0, %2, %c0_1] : memref<1x4x18x18xf32, #tpu.memory_space<vmem>>, vector<1x4x10x18xf32>
    %4 = vector.shape_cast %3 : vector<1x4x10x18xf32> to vector<4x10x18xf32>
    %5 = vector.extract_strided_slice %4 {offsets = [0, 0, 0], sizes = [4, 8, 16], strides = [1, 1, 1]} : vector<4x10x18xf32> to vector<4x8x16xf32>
    %6 = vector.shape_cast %5 : vector<4x8x16xf32> to vector<4x128xf32>
    %7 = vector.extract_strided_slice %4 {offsets = [0, 0, 1], sizes = [4, 8, 16], strides = [1, 1, 1]} : vector<4x10x18xf32> to vector<4x8x16xf32>
    %8 = vector.shape_cast %7 : vector<4x8x16xf32> to vector<4x128xf32>
    %9 = vector.extract_strided_slice %4 {offsets = [0, 0, 2], sizes = [4, 8, 16], strides = [1, 1, 1]} : vector<4x10x18xf32> to vector<4x8x16xf32>
    %10 = vector.shape_cast %9 : vector<4x8x16xf32> to vector<4x128xf32>
    %11 = vector.extract_strided_slice %4 {offsets = [0, 1, 0], sizes = [4, 8, 16], strides = [1, 1, 1]} : vector<4x10x18xf32> to vector<4x8x16xf32>
    %12 = vector.shape_cast %11 : vector<4x8x16xf32> to vector<4x128xf32>
    %13 = vector.extract_strided_slice %4 {offsets = [0, 1, 1], sizes = [4, 8, 16], strides = [1, 1, 1]} : vector<4x10x18xf32> to vector<4x8x16xf32>
    %14 = vector.shape_cast %13 : vector<4x8x16xf32> to vector<4x128xf32>
    %15 = vector.extract_strided_slice %4 {offsets = [0, 1, 2], sizes = [4, 8, 16], strides = [1, 1, 1]} : vector<4x10x18xf32> to vector<4x8x16xf32>
    %16 = vector.shape_cast %15 : vector<4x8x16xf32> to vector<4x128xf32>
    %17 = vector.extract_strided_slice %4 {offsets = [0, 2, 0], sizes = [4, 8, 16], strides = [1, 1, 1]} : vector<4x10x18xf32> to vector<4x8x16xf32>
    %18 = vector.shape_cast %17 : vector<4x8x16xf32> to vector<4x128xf32>
    %19 = vector.extract_strided_slice %4 {offsets = [0, 2, 1], sizes = [4, 8, 16], strides = [1, 1, 1]} : vector<4x10x18xf32> to vector<4x8x16xf32>
    %20 = vector.shape_cast %19 : vector<4x8x16xf32> to vector<4x128xf32>
    %21 = vector.extract_strided_slice %4 {offsets = [0, 2, 2], sizes = [4, 8, 16], strides = [1, 1, 1]} : vector<4x10x18xf32> to vector<4x8x16xf32>
    %22 = vector.shape_cast %21 : vector<4x8x16xf32> to vector<4x128xf32>
    %23 = tpu.concatenate %6, %8, %10, %12, %14, %16, %18, %20, %22 in 0 : vector<4x128xf32>, vector<4x128xf32>, vector<4x128xf32>, vector<4x128xf32>, vector<4x128xf32>, vector<4x128xf32>, vector<4x128xf32>, vector<4x128xf32>, vector<4x128xf32> -> vector<36x128xf32>
    %c0_2 = arith.constant 0 : index
    %c0_3 = arith.constant 0 : index
    %24 = vector.load %arg3[%c0_2, %c0_3] : memref<8x36xf32, #tpu.memory_space<vmem>>, vector<8x36xf32>
    %cst = arith.constant dense<0.000000e+00> : vector<8x128xf32>
    %25 = tpu.matmul %24, %23, %cst {dimension_numbers = #tpu.dot_dimension_numbers<[1], [0], [0], [1], [0, 0, 1, 1], [], []>} : vector<8x36xf32>, vector<36x128xf32>, vector<8x128xf32> -> vector<8x128xf32>
    %c0_4 = arith.constant 0 : index
    %c0_5 = arith.constant 0 : index
    %26 = vector.load %arg4[%c0_4, %c0_5] : memref<8x1xf32, #tpu.memory_space<vmem>>, vector<8x1xf32>
    %27 = vector.broadcast %26 : vector<8x1xf32> to vector<8x128xf32>
    %28 = arith.addf %25, %27 : vector<8x128xf32>
    %cst_6 = arith.constant 0.000000e+00 : f32
    %29 = vector.broadcast %cst_6 : f32 to vector<8x128xf32>
    %30 = arith.cmpf ogt, %28, %29 : vector<8x128xf32>
    %cst_7 = arith.constant 2.000000e-01 : f32
    %31 = vector.broadcast %cst_7 : f32 to vector<8x128xf32>
    %32 = arith.mulf %31, %28 : vector<8x128xf32>
    %33 = arith.select %30, %28, %32 : vector<8x128xi1>, vector<8x128xf32>
    %c0_8 = arith.constant 0 : index
    %c0_9 = arith.constant 0 : index
    %c0_10 = arith.constant 0 : index
    %34 = vector.load %arg5[%c0_8, %c0_9, %c0_10] : memref<1x8x128xf32, #tpu.memory_space<vmem>>, vector<1x8x128xf32>
    %35 = vector.shape_cast %34 : vector<1x8x128xf32> to vector<8x128xf32>
    %36 = vector.shape_cast %33 : vector<8x128xf32> to vector<1x8x128xf32>
    tpu.vector_store %arg5[%c0_8, %c0_9, %c0_10], %36 {strides = array<i32>} : memref<1x8x128xf32, #tpu.memory_space<vmem>>, vector<1x8x128xf32>,
    return
  }
  func.func @transform_0(%arg0: i32, %arg1: i32) -> (i32, i32, i32, i32) {
    %c0_i32 = arith.constant 0 : i32
    %c0_i32_0 = arith.constant 0 : i32
    %c0_i32_1 = arith.constant 0 : i32
    %c0_i32_2 = arith.constant 0 : i32
    return %arg0, %c0_i32, %c0_i32_0, %c0_i32_1 : i32, i32, i32, i32
  }
  func.func @transform_1(%arg0: i32, %arg1: i32) -> (i32, i32) {
    %c0_i32 = arith.constant 0 : i32
    %c0_i32_0 = arith.constant 0 : i32
    %c0_i32_1 = arith.constant 0 : i32
    return %c0_i32, %c0_i32_0 : i32, i32
  }
  func.func @transform_2(%arg0: i32, %arg1: i32) -> (i32, i32) {
    %c0_i32 = arith.constant 0 : i32
    %c0_i32_0 = arith.constant 0 : i32
    %c0_i32_1 = arith.constant 0 : i32
    return %c0_i32, %c0_i32_0 : i32, i32
  }
  func.func @transform_3(%arg0: i32, %arg1: i32) -> (i32, i32, i32) {
    %c0_i32 = arith.constant 0 : i32
    %c0_i32_0 = arith.constant 0 : i32
    return %arg0, %c0_i32, %arg1 : i32, i32, i32
  }
}

</mosaic_0001>

<bundles_post_ra>
// kernel: tpu_custom_call.1
= control target key start
LH: loop header
LB: loop body
LE: loop exit
PB: predicated region body
PF: predicated region fallthrough
CT: control target
= control target key end

     0   :  { %8 = vsyncpa [#allocation3], 0  ;;  %s2349_s0 = inlined_call_operand.vmem [shape: f32[2,4,18,18], index: 0, kind: input, shape index: {}]   ;;  %s2350_s1 = inlined_call_operand.vmem [shape: f32[8,36], index: 1, kind: input, shape index: {}]   ;;  %s2351_s2 = inlined_call_operand.vmem [shape: f32[8,1], index: 2, kind: input, shape index: {}]   ;;  %s2352_s3 = inlined_call_operand.hbm [shape: f32[2,8,256], index: 3, kind: output, shape index: {}]  }
   0x1   :  { %10 = vsyncpa [#allocation3 + $0x1], 0  ;;  %s1691_s12 = smov 0   ;;  %s1693_s13 = smov 0  }
   0x2   :  { %s1695_s14 = smov 0   ;;  %s1697_s15 = smov 0  }
   0x3   :  { %s1699_s16 = smov 0   ;;  %s1701_s17 = smov 0  }
   0x4   :  { %s1703_s18 = smov 0   ;;  %s1705_s19 = smov 0  }
   0x5 LB: > { %s1436_s20 = sadd.s32 4294967295, %s1654_s19   ;;  %s1437_s21 = sadd.s32 4294967294, %s1654_s19   ;;  %s1654_s19 = sphi %s1705_s19, %s16_s19   ;;  %s1650_s18 = sphi %s1703_s18, %s2361_s18   ;;  %s1646_s17 = sphi %s1701_s17, %s2360_s17   ;;  %s1642_s16 = sphi %s1699_s16, %s2359_s16   ;;  %s1638_s15 = sphi %s1697_s15, %s2358_s15   ;;  %s1634_s14 = sphi %s1695_s14, %s2357_s14   ;;  %s1630_s13 = sphi %s1693_s13, %s2356_s13   ;;  %s1626_s12 = sphi %s1691_s12, %s2355_s12  }
   0x6   : > { %s25_s22 = sadd.s32 1, %s1646_s17  ;;  %s28_s23 = sadd.s32 1, %s1650_s18 }
   0x7   : > { %p26_p0 = scmp.ge.s32.totalorder %s25_s22, 2  ;;  %p115_p1 = scmp.ne.s32.totalorder %s1634_s14, %s1630_s13 }
   0x8   : > { %p116_p2 = scmp.eq.s32.totalorder %s1436_s20, 3  ;;  %p121_p5 = scmp.ne.s32.totalorder %s1630_s13, %s1626_s12 }
   0x9   : > { %s2363_s22 = smov (%p26_p0, %s25_s22), 0  ;;  %s2365_s23 = smov (!%p26_p0, %s28_s23), %s1650_s18 }
   0xa   : > { %s101_s24 = ssub.s32 %s1646_s17, %s2363_s22  ;;  %p1742_p3 = por %p116_p2, %p115_p1 }
   0xb   : > { %p30_p4 = scmp.ge.s32.totalorder %s2365_s23, 2  ;;  %p122_p6 = scmp.eq.s32.totalorder %s1437_s21, 3 }
   0xc   : > { %p1440_p7 = scmp.ge.s32.totalorder %s1654_s19, 1  ;;  %p154_p9 = scmp.lt.s32.totalorder %s1654_s19, 5 }
   0xd   : > { %s2367_s23 = smov (%p30_p4, %s2365_s23), 0  ;;  %p1751_p8 = por %p122_p6, %p121_p5 }
   0xe   : > { %s100_s27 = ssub.s32 %s1650_s18, %s2367_s23  ;;  %s105_s28 = sadd.s32 1, %s1634_s14 }
   0xf   : > { %s102_s29 = sor.u32 %s101_s24, %s100_s27  ;;  %p155_p10 = pnand %p1440_p7, %p154_p9 }
  0x10   : > { %p103_p11 = scmp.eq.s32.totalorder %s102_s29, 0  ;;  %p178_p12 = scmp.lt.s32.totalorder (!%p155_p10), %s1642_s16, 1 }
  0x11   : > { %158 = sbr.rel (%p155_p10) target bundleno = 621 (0x26d), region = 32  ;;  %s1443_s6 = sshll.u32 (!%p155_p10), %s1638_s15, 3 }
  0x12   : > { %s1760_s30 = scalar_select %p103_p11, %s1634_s14, %s105_s28  }
  0x13   : > { %s1657_s11 = smov (!%p155_p10), 127   ;;  %s1658_s20 = smov (!%p155_p10), 126  }
  0x14   : > { %s1661_s21 = smov (!%p155_p10), 16   ;;  %s1662_s24 = smov (!%p155_p10), 32  }
  0x15   : > { %s1663_s27 = smov (!%p155_p10), 48   ;;  %s1664_s28 = smov (!%p155_p10), 64  }
  0x16   : > { %s179_s4 = scalar_select %p178_p12, %s1642_s16, 1  ;;  %v1656_v0 = vmov 0.0   ;;  %vm891_vm0 = vcmask 1045504   ;;  %vm541_vm1 = vcmask 1046528   ;;  %v1659_v33 = vmov 1983009808  }
  0x17   : > { %1457 = vmatprep.subr.mxu0 %v1656_v0  ;;  %v196_v34 = vunpack.c.l.s4 %v1659_v33  ;;  %v198_v35 = vlaneseq  ;;  %v1660_v43 = vmov 1934713408   ;;  %s1665_s29 = smov 80   ;;  %vm289_vm2 = vcmask 130048  }
  0x18   : > { %s1470_s5 = smul.u32 96, %s179_s4  ;;  %v228_v44 = vunpack.c.l.s4 %v1660_v43  ;;  %s1666_s4 = smov 96   ;;  %vm291_vm3 = vcmask 261120   ;;  %vm293_vm4 = vcmask 392192   ;;  %vm295_vm5 = vcmask 523264  }
  0x19   : > { %v197_v36 = vunpack.c.0.s8 %v196_v34  ;;  %v199_v37 = vshrl.u32 %v198_v35, 7  ;;  %vm297_vm6 = vcmask 654336   ;;  %vm299_vm7 = vcmask 785408  }
  0x1a   : > { %s182_s9 = scalar_lea.vmem %s2349_s0, %s1470_s5  ;;  %v229_v49 = vunpack.c.0.s8 %v228_v44  ;;  %s1667_s5 = smov 112   ;;  %vm1668_vm8 = vmmov 0   ;;  %vm301_vm9 = vcmask 916480   ;;  %vm1253_vm10 = vcmask 1043456  }
  0x1b   : > { %s184_s10 = scalar_lea.vmem %s182_s9, %s1443_s6  ;;  %v1820_v40 = vsub.s32 %v197_v36, %v199_v37  ;;  %1467 = vmatprep.mubr.msk.f32.mxu0 %vm1668_vm8, %v1656_v0  ;;  %vm1265_vm11 = vcmask 293888  }
  0x1c   : > { %v1769_v1 = vld [vmem:[%s184_s10 + $0x30] sm:$0xff]  ;;  %v190_v2 = vld [vmem:[%s184_s10 + $0x38] sm:$0x3]  ;;  %v1771_v3 = vld [vmem:[%s184_s10] sm:$0xff]  ;;  %v1839_v51 = vsub.s32 %v229_v49, %v199_v37 }
  0x1d   : > { %v898_v4 = vrot.slane %v1769_v1, 2  ;;  %v899_v5 = vrot.slane %v190_v2, 2  ;;  %v186_v6 = vld [vmem:[%s184_s10 + $0x8] sm:$0x3]  ;;  %v892_v7 = vrot.slane %v1771_v3, 2  ;;  %v1778_v12 = vld [vmem:[%s184_s10 + $0x18] sm:$0xff] }
  0x1e   : > { %v1775_v8 = vld [vmem:[%s184_s10 + $0x48] sm:$0xff]  ;;  %v893_v9 = vrot.slane %v186_v6, 2  ;;  %v192_v10 = vld [vmem:[%s184_s10 + $0x50] sm:$0x3]  ;;  %v188_v15 = vld [vmem:[%s184_s10 + $0x20] sm:$0x3] }
  0x1f   : > { %v901_v11 = vrot.slane %v1775_v8, 2  ;;  %v1781_v13 = vsel %vm891_vm0, %v898_v4, %v899_v5  ;;  %v902_v14 = vrot.slane %v192_v10, 2  ;;  %v895_v16 = vrot.slane %v1778_v12, 2  ;;  %s175_s10 = sand.u32 1, %s1630_s13  }
  0x20   : > { %1015 = vrot.lane.b32.xlu1 %v1781_v13, %s1657_s11  ;;  %v1787_v17 = vsel %vm891_vm0, %v892_v7, %v893_v9  ;;  %v896_v18 = vrot.slane %v188_v15, 2  ;;  %v545_v21 = vrot.slane %v1778_v12, 1  ;;  %v546_v22 = vrot.slane %v188_v15, 1 }
  0x21   : > { %1011 = vrot.lane.b32.xlu0 %v1787_v17, %s1657_s11  ;;  %v1792_v19 = vsel %vm891_vm0, %v901_v11, %v902_v14  ;;  %v542_v23 = vrot.slane %v1771_v3, 1  ;;  %v543_v24 = vrot.slane %v186_v6, 1  ;;  %v551_v26 = vrot.slane %v1775_v8, 1 }
  0x22   : > { %v1795_v20 = vsel %vm891_vm0, %v895_v16, %v896_v18  ;;  %v547_v25 = vsel %vm541_vm1, %v545_v21, %v546_v22  ;;  %v552_v27 = vrot.slane %v192_v10, 1  ;;  %v548_v29 = vrot.slane %v1769_v1, 1 }
  0x23   : > { %v544_v28 = vsel %vm541_vm1, %v542_v23, %v543_v24  ;;  %v549_v30 = vrot.slane %v190_v2, 1  ;;  %v908_v41 = vcombine.low %v1787_v17, %v1781_v13  ;;  %v924_v42 = vcombine.low %v1795_v20, %v1792_v19 }
  0x24   : > { %1017 = vrot.lane.b32.xlu1 %v1792_v19, %s1657_s11  ;;  %v553_v31 = vsel %vm541_vm1, %v551_v26, %v552_v27  ;;  %v909_v59 = vcombine.high %v1787_v17, %v1781_v13  ;;  %v925_v60 = vcombine.high %v1795_v20, %v1792_v19  ;;  %v193_v14 = vcombine.low %v1771_v3, %v1769_v1 }
  0x25   : > { %1013 = vrot.lane.b32.xlu0 %v1795_v20, %s1657_s11  ;;  %v550_v32 = vsel %vm541_vm1, %v548_v29, %v549_v30  ;;  %v574_v38 = vcombine.low %v547_v25, %v553_v31  ;;  %v916_v47 = vrot.slane %v908_v41, %v1820_v40  ;;  %v932_v48 = vrot.slane %v924_v42, %v1820_v40 }
  0x26   : > { %v558_v39 = vcombine.low %v544_v28, %v550_v32  ;;  %v575_v55 = vcombine.high %v547_v25, %v553_v31  ;;  %v559_v56 = vcombine.high %v544_v28, %v550_v32  ;;  %v923_v6 = vrot.slane %v909_v59, %v1820_v40 }
  0x27   : > { %v582_v45 = vrot.slane %v574_v38, %v1820_v40  ;;  %v940_v52 = vcombine.low %v916_v47, %v932_v48  ;;  %v941_v62 = vcombine.high %v916_v47, %v932_v48  ;;  %v939_v7 = vrot.slane %v925_v60, %v1820_v40 }
  0x28   : > { %1128 = vrot.lane.b32.xlu1 %v1795_v20, %s1658_s20  ;;  %v566_v46 = vrot.slane %v558_v39, %v1820_v40  ;;  %v1866_v2 = vrot.slane %v559_v56, %v1820_v40  ;;  %v1869_v4 = vrot.slane %v575_v55, %v1820_v40  ;;  %v209_v15 = vcombine.low %v1778_v12, %v1775_v8 }
  0x29   : > { %1126 = vrot.lane.b32.xlu0 %v1787_v17, %s1658_s20  ;;  %v1849_v54 = vrot.slane %v940_v52, %v1839_v51  ;;  %v955_v5 = vrot.slane %v941_v62, %v1839_v51  ;;  %v201_v18 = vrot.slane %v193_v14, %v1820_v40  ;;  %v957_v23 = vcombine.high %v923_v6, %v939_v7 }
  0x2a   : > { %v590_v50 = vcombine.low %v566_v46, %v582_v45  ;;  %v591_v58 = vcombine.high %v566_v46, %v582_v45  ;;  %v606_v10 = vcombine.low %v1866_v2, %v1869_v4 }
  0x2b   : > { %v972_v61 = vcombine.high %v1849_v54, %v1656_v0  ;;  %v973_v11 = vcombine.high %v955_v5, %v1656_v0  ;;  %v971_v26 = vrot.slane %v957_v23, %v1839_v51 }
  0x2c   : > { %1132 = vrot.lane.b32.xlu1 %v1792_v19, %s1658_s20  ;;  %v1844_v53 = vrot.slane %v590_v50, %v1839_v51  ;;  %v605_v63 = vrot.slane %v591_v58, %v1839_v51  ;;  %v614_v16 = vrot.slane %v606_v10, %v1839_v51  ;;  %v217_v19 = vrot.slane %v209_v15, %v1820_v40 }
  0x2d   : > { %1130 = vrot.lane.b32.xlu0 %v1781_v13, %s1658_s20  ;;  %v956_v13 = vcombine.low %v923_v6, %v939_v7  ;;  %v975_v29 = vcombine.high %v971_v26, %v1656_v0 }
  0x2e   : > { %v622_v57 = vcombine.high %v1844_v53, %v1656_v0  ;;  %v623_v9 = vcombine.high %v605_v63, %v1656_v0  ;;  %v624_v20 = vcombine.high %v614_v16, %v1656_v0  ;;  %v226_v21 = vcombine.high %v201_v18, %v217_v19 }
  0x2f   : > { %v964_v17 = vrot.slane %v956_v13, %v1839_v51  ;;  %v225_v24 = vcombine.low %v201_v18, %v217_v19 }
  0x30   : > { %778 = vrot.lane.b32.xlu1 %v547_v25, %s1658_s20 }
  0x31   : > { %776 = vrot.lane.b32.xlu0 %v544_v28, %s1658_s20  ;;  %v974_v22 = vcombine.high %v964_v17, %v1656_v0  ;;  %v1902_v27 = vrot.slane %v225_v24, %v1839_v51 }
  0x34   : > { %782 = vrot.lane.b32.xlu1 %v553_v31, %s1658_s20 }
  0x35   : > { %780 = vrot.lane.b32.xlu0 %v550_v32, %s1658_s20 }
  0x38   : > { %663 = vrot.lane.b32.xlu1 %v547_v25, %s1657_s11  ;;  %v1897_v25 = vrot.slane %v226_v21, %v1839_v51 }
  0x39   : > { %661 = vrot.lane.b32.xlu0 %v544_v28, %s1657_s11  ;;  %v257_v28 = vcombine.high %v1902_v27, %v1656_v0 }
  0x3c   : > { %667 = vrot.lane.b32.xlu1 %v553_v31, %s1657_s11 }
  0x3d   : > { %665 = vrot.lane.b32.xlu0 %v550_v32, %s1657_s11 }
  0x40   : > { %309 = vrot.lane.b32.xlu1 %v1778_v12, %s1657_s11 }
  0x41   : > { %307 = vrot.lane.b32.xlu0 %v1771_v3, %s1657_s11 }
  0x44   : > { %313 = vrot.lane.b32.xlu1 %v1775_v8, %s1657_s11 }
  0x45   : > { %311 = vrot.lane.b32.xlu0 %v1769_v1, %s1657_s11  ;;  %s1441_s11 = sshll.u32 %s175_s10, 3 }
  0x48   : > { %424 = vrot.lane.b32.xlu1 %v1778_v12, %s1658_s20 }
  0x49   : > { %422 = vrot.lane.b32.xlu0 %v1771_v3, %s1658_s20 }
  0x4c   : > { %428 = vrot.lane.b32.xlu1 %v1775_v8, %s1658_s20 }
  0x4d   : > { %426 = vrot.lane.b32.xlu0 %v1769_v1, %s1658_s20  ;;  %s1447_s20 = sshll.u32 %s1642_s16, 1  ;;  %s1347_s16 = scalar_lea.sflag [#allocation3], %s175_s10 }
  0x50   : > { %627 = vrot.lane.b32.xlu1 %v622_v57, %s1661_s21 }
  0x51   : > { %977 = vrot.lane.b32.xlu0 %v972_v61, %s1661_s21 }
  0x54   : > { %631 = vrot.lane.b32.xlu1 %v605_v63, %s1662_s24 }
  0x55   : > { %981 = vrot.lane.b32.xlu0 %v955_v5, %s1662_s24 }
  0x58   : > { %635 = vrot.lane.b32.xlu1 %v623_v9, %s1663_s27 }
  0x59   : > { %985 = vrot.lane.b32.xlu0 %v973_v11, %s1663_s27 }
  0x5c   : > { %639 = vrot.lane.b32.xlu1 %v614_v16, %s1664_s28 }
  0x5d   : > { %989 = vrot.lane.b32.xlu0 %v964_v17, %s1664_s28 }
  0x60   : > { %643 = vrot.lane.b32.xlu1 %v624_v20, %s1665_s29 }
  0x61   : > { %993 = vrot.lane.b32.xlu0 %v974_v22, %s1665_s29 }
  0x64   : > { %266 = vrot.lane.b32.xlu1 %v1897_v25, %s1662_s24 }
  0x65   : > { %997 = vrot.lane.b32.xlu0 %v971_v26, %s1666_s4 }
  0x69   : > { %262 = vrot.lane.b32.xlu0 %v257_v28, %s1661_s21 }
  0x6d   : > { %1001 = vrot.lane.b32.xlu0 %v975_v29, %s1667_s5 }
  0x92   : > { %v1912_v30 = vpop.permute.xlu1 %1015 }
  0x93   : > { %v1914_v31 = vpop.permute.xlu0 %1011 }
  0x94   : > { %v1023_v11 = vcombine.low %v1914_v31, %v1912_v30 }
  0x96   : > { %v1916_v32 = vpop.permute.xlu1 %1017  ;;  %v1969_v22 = vrot.slane %v1023_v11, %v1820_v40 }
  0x97   : > { %v1918_v33 = vpop.permute.xlu0 %1013 }
  0x98   : > { %v1039_v63 = vcombine.low %v1918_v33, %v1916_v32 }
  0x9a   : > { %v1920_v34 = vpop.permute.xlu1 %1128  ;;  %v1965_v16 = vrot.slane %v1039_v63, %v1820_v40 }
  0x9b   : > { %v1922_v35 = vpop.permute.xlu0 %1126 }
  0x9e   : > { %v1924_v36 = vpop.permute.xlu1 %1132 }
  0x9f   : > { %v1926_v37 = vpop.permute.xlu0 %1130 }
  0xa2   : > { %v1928_v38 = vpop.permute.xlu1 %778 }
  0xa3   : > { %v1930_v39 = vpop.permute.xlu0 %776 }
  0xa6   : > { %v1932_v41 = vpop.permute.xlu1 %782 }
  0xa7   : > { %v1934_v42 = vpop.permute.xlu0 %780  ;;  %v804_v23 = vcombine.low %v1928_v38, %v1932_v41 }
  0xa8   : > { %v788_v28 = vcombine.low %v1930_v39, %v1934_v42 }
  0xaa   : > { %v1936_v43 = vpop.permute.xlu1 %663 }
  0xab   : > { %v1938_v44 = vpop.permute.xlu0 %661 }
  0xae   : > { %v1940_v45 = vpop.permute.xlu1 %667 }
  0xaf   : > { %v1942_v46 = vpop.permute.xlu0 %665 }
  0xb2   : > { %v310_v47 = vpop.permute.xlu1 %309 }
  0xb3   : > { %v308_v48 = vpop.permute.xlu0 %307 }
  0xb6   : > { %v314_v49 = vpop.permute.xlu1 %313 }
  0xb7   : > { %v335_v50 = vcombine.low %v310_v47, %v314_v49  ;;  %v336_v52 = vcombine.high %v310_v47, %v314_v49  ;;  %v312_v55 = vpop.permute.xlu0 %311 }
  0xb8   : > { %v319_v56 = vcombine.low %v308_v48, %v312_v55  ;;  %v320_v57 = vcombine.high %v308_v48, %v312_v55  ;;  %v1056_v55 = vcombine.high %v1969_v22, %v1965_v16 }
  0xb9   : > { %v343_v58 = vrot.slane %v335_v50, %v1820_v40  ;;  %v1946_v59 = vrot.slane %v336_v52, %v1820_v40  ;;  %v1024_v50 = vcombine.high %v1914_v31, %v1912_v30  ;;  %v1040_v52 = vcombine.high %v1918_v33, %v1916_v32 }
  0xba   : > { %v327_v60 = vrot.slane %v319_v56, %v1820_v40  ;;  %v1950_v61 = vrot.slane %v320_v57, %v1820_v40  ;;  %v425_v62 = vpop.permute.xlu1 %424  ;;  %v1154_v30 = vcombine.low %v1920_v34, %v1924_v36  ;;  %v1138_v31 = vcombine.low %v1922_v35, %v1926_v37 }
  0xbb   : > { %v423_v5 = vpop.permute.xlu0 %422  ;;  %v2003_v32 = vrot.slane %v804_v23, %v1820_v40  ;;  %v2008_v33 = vrot.slane %v788_v28, %v1820_v40  ;;  %v805_v23 = vcombine.high %v1928_v38, %v1932_v41 }
  0xbc   : > { %v351_v6 = vcombine.low %v327_v60, %v343_v58  ;;  %v352_v7 = vcombine.high %v327_v60, %v343_v58  ;;  %v367_v9 = vcombine.low %v1950_v61, %v1946_v59  ;;  %v368_v10 = vcombine.high %v1950_v61, %v1946_v59 }
  0xbe   : > { %v429_v13 = vpop.permute.xlu1 %428  ;;  %v366_v14 = vrot.slane %v352_v7, %v1839_v51  ;;  %v1962_v15 = vrot.slane %v351_v6, %v1839_v51 }
  0xbf   : > { %v450_v17 = vcombine.low %v425_v62, %v429_v13  ;;  %v451_v18 = vcombine.high %v425_v62, %v429_v13  ;;  %v427_v19 = vpop.permute.xlu0 %426  ;;  %v2016_v13 = vrot.slane %v1040_v52, %v1820_v40 }
  0xc0   : > { %v434_v20 = vcombine.low %v423_v5, %v427_v19  ;;  %v435_v21 = vcombine.high %v423_v5, %v427_v19  ;;  %392 = vrot.lane.b32.xlu1 %v366_v14, %s1662_s24  ;;  %v383_v48 = vcombine.high %v1962_v15, %v1656_v0  ;;  %v384_v5 = vcombine.high %v366_v14, %v1656_v0 }
  0xc1   : > { %v458_v24 = vrot.slane %v450_v17, %v1820_v40  ;;  %v1975_v26 = vrot.slane %v451_v18, %v1820_v40  ;;  %v1139_v19 = vcombine.high %v1922_v35, %v1926_v37  ;;  %v1038_v35 = vrot.slane %v1024_v50, %v1820_v40 }
  0xc2   : > { %v442_v29 = vrot.slane %v434_v20, %v1820_v40  ;;  %v1981_v47 = vrot.slane %v435_v21, %v1820_v40  ;;  %v628_v49 = vpop.permute.xlu1 %627  ;;  %v2027_v20 = vrot.slane %v1154_v30, %v1820_v40  ;;  %v2030_v21 = vrot.slane %v1138_v31, %v1820_v40 }
  0xc3   : > { %v978_v56 = vpop.permute.xlu0 %977  ;;  %v654_v57 = vsel %vm289_vm2, %v1844_v53, %v628_v49  ;;  %v2040_v37 = vrot.slane %v1056_v55, %v1839_v51  ;;  %v1071_v38 = vcombine.low %v1038_v35, %v2016_v13  ;;  %v819_v50 = vrot.slane %v805_v23, %v1820_v40 }
  0xc4   : > { %v466_v58 = vcombine.low %v442_v29, %v458_v24  ;;  %v467_v60 = vcombine.high %v442_v29, %v458_v24  ;;  %v482_v62 = vcombine.low %v1981_v47, %v1975_v26  ;;  %v483_v63 = vcombine.high %v1981_v47, %v1975_v26  ;;  %388 = vrot.lane.b32.xlu1 %v383_v48, %s1661_s21  ;;  %v1259_v26 = vld [vmem:[%s2351_s2] sm:$0xff] }
  0xc5   : > { %v1004_v53 = vsel %vm289_vm2, %v1849_v54, %v978_v56  ;;  %v1155_v54 = vcombine.high %v1920_v34, %v1924_v36  ;;  %v789_v34 = vcombine.high %v1930_v39, %v1934_v42  ;;  %v821_v36 = vcombine.high %v2008_v33, %v2003_v32 }
  0xc6   : > { %v481_v6 = vrot.slane %v467_v60, %v1839_v51  ;;  %v2013_v7 = vrot.slane %v466_v58, %v1839_v51  ;;  %v632_v11 = vpop.permute.xlu1 %631  ;;  %v1153_v42 = vrot.slane %v1139_v19, %v1820_v40  ;;  %v1171_v49 = vcombine.high %v2030_v21, %v2027_v20 }
  0xc7   : > { %v982_v17 = vpop.permute.xlu0 %981  ;;  %v655_v18 = vsel %vm291_vm3, %v654_v57, %v632_v11  ;;  %v1169_v41 = vrot.slane %v1155_v54, %v1820_v40  ;;  %v803_v52 = vrot.slane %v789_v34, %v1820_v40  ;;  %v689_v55 = vcombine.low %v1936_v43, %v1940_v45 }
  0xc8   : > { %396 = vrot.lane.b32.xlu1 %v384_v5, %s1663_s27  ;;  %507 = vrot.lane.b32.xlu0 %v481_v6, %s1662_s24  ;;  %v1005_v14 = vsel %vm291_vm3, %v1004_v53, %v982_v17  ;;  %v498_v24 = vcombine.high %v2013_v7, %v1656_v0  ;;  %v673_v56 = vcombine.low %v1938_v44, %v1942_v46 }
  0xc9   : > { %v835_v57 = vrot.slane %v821_v36, %v1839_v51  ;;  %v499_v58 = vcombine.high %v481_v6, %v1656_v0  ;;  %v1186_v5 = vcombine.low %v1153_v42, %v1169_v41  ;;  %v1079_v11 = vrot.slane %v1071_v38, %v1839_v51 }
  0xca   : > { %v636_v28 = vpop.permute.xlu1 %635  ;;  %v836_v17 = vcombine.low %v803_v52, %v819_v50  ;;  %v681_v54 = vrot.slane %v673_v56, %v1820_v40  ;;  %v1185_v6 = vrot.slane %v1171_v49, %v1839_v51  ;;  %v1072_v36 = vcombine.high %v1038_v35, %v2016_v13 }
  0xcb   : > { %v986_v29 = vpop.permute.xlu0 %985  ;;  %v656_v48 = vsel %vm293_vm4, %v655_v18, %v636_v28  ;;  %v697_v18 = vrot.slane %v689_v55, %v1820_v40  ;;  %v690_v28 = vcombine.high %v1936_v43, %v1940_v45  ;;  %v1187_v13 = vcombine.high %v1153_v42, %v1169_v41 }
  0xcc   : > { %1096 = vrot.lane.b32.xlu1 %v2040_v37, %s1662_s24  ;;  %503 = vrot.lane.b32.xlu0 %v498_v24, %s1661_s21  ;;  %v1006_v39 = vsel %vm293_vm4, %v1005_v14, %v986_v29  ;;  %v1194_v24 = vrot.slane %v1186_v5, %v1839_v51  ;;  %v674_v29 = vcombine.high %v1938_v44, %v1942_v46 }
  0xcd   : > { %v844_v38 = vrot.slane %v836_v17, %v1839_v51  ;;  %v820_v35 = vcombine.low %v2008_v33, %v2003_v32  ;;  %v1086_v43 = vrot.slane %v1072_v36, %v1839_v51  ;;  %v837_v45 = vcombine.high %v803_v52, %v819_v50 }
  0xce   : > { %v640_v60 = vpop.permute.xlu1 %639  ;;  %v704_v44 = vrot.slane %v690_v28, %v1820_v40  ;;  %v688_v46 = vrot.slane %v674_v29, %v1820_v40  ;;  %v1055_v56 = vcombine.low %v1969_v22, %v1965_v16  ;;  %v1201_v32 = vrot.slane %v1187_v13, %v1839_v51 }
  0xcf   : > { %v990_v30 = vpop.permute.xlu0 %989  ;;  %v657_v31 = vsel %vm295_vm5, %v656_v48, %v640_v60  ;;  %v706_v48 = vcombine.high %v681_v54, %v697_v18  ;;  %v851_v42 = vrot.slane %v837_v45, %v1839_v51  ;;  %v2101_v33 = vrot.slane %v820_v35, %v1839_v51 }
  0xd0   : > { %861 = vrot.lane.b32.xlu1 %v835_v57, %s1662_s24  ;;  %511 = vrot.lane.b32.xlu0 %v499_v58, %s1663_s27  ;;  %v1007_v53 = vsel %vm295_vm5, %v1006_v39, %v990_v30  ;;  %v721_v41 = vcombine.low %v688_v46, %v704_v44  ;;  %v1170_v50 = vcombine.low %v2030_v21, %v2027_v20 }
  0xd1   : > { %v720_v55 = vrot.slane %v706_v48, %v1839_v51  ;;  %v852_v52 = vcombine.high %v2101_v33, %v1656_v0  ;;  %v2111_v22 = vrot.slane %v1055_v56, %v1839_v51  ;;  %v1088_v58 = vcombine.high %v2040_v37, %v1656_v0 }
  0xd2   : > { %v644_v19 = vpop.permute.xlu1 %643  ;;  %v729_v16 = vrot.slane %v721_v41, %v1839_v51  ;;  %v2120_v20 = vrot.slane %v1170_v50, %v1839_v51  ;;  %v705_v21 = vcombine.low %v681_v54, %v697_v18  ;;  %v853_v30 = vcombine.high %v835_v57, %v1656_v0 }
  0xd3   : > { %v994_v14 = vpop.permute.xlu0 %993  ;;  %v2071_v23 = vsel %vm297_vm6, %v657_v31, %v644_v19  ;;  %v1087_v60 = vcombine.high %v2111_v22, %v1656_v0  ;;  %v1089_v37 = vcombine.high %v1079_v11, %v1656_v0  ;;  %v854_v57 = vcombine.high %v844_v38, %v1656_v0 }
  0xd4   : > { %1104 = vrot.lane.b32.xlu1 %v1079_v11, %s1664_s28  ;;  %1211 = vrot.lane.b32.xlu0 %v1185_v6, %s1662_s24  ;;  %v1008_v34 = vsel %vm297_vm6, %v1007_v53, %v994_v14  ;;  %v1202_v31 = vcombine.high %v2120_v20, %v1656_v0  ;;  %v1203_v53 = vcombine.high %v1185_v6, %v1656_v0 }
  0xd5   : > { %v2132_v5 = vrot.slane %v705_v21, %v1839_v51  ;;  %v1090_v11 = vcombine.high %v1086_v43, %v1656_v0  ;;  %v1204_v18 = vcombine.high %v1194_v24, %v1656_v0  ;;  %v1205_v54 = vcombine.high %v1201_v32, %v1656_v0 }
  0xd6   : > { %v738_v6 = vcombine.high %v720_v55, %v1656_v0  ;;  %v855_v19 = vcombine.high %v851_v42, %v1656_v0  ;;  %v739_v14 = vcombine.high %v729_v16, %v1656_v0  ;;  %v722_v36 = vcombine.high %v688_v46, %v704_v44  ;;  %v2212_v47 = vpop.permute.xlu1 %266 }
  0xd7   : > { %v998_v39 = vpop.permute.xlu0 %997  ;;  %v737_v17 = vcombine.high %v2132_v5, %v1656_v0  ;;  %v375_v28 = vrot.slane %v367_v9, %v1839_v51  ;;  %v258_v9 = vcombine.high %v1897_v25, %v1656_v0  ;;  %v382_v13 = vrot.slane %v368_v10, %v1839_v51 }
  0xd8   : > { %869 = vrot.lane.b32.xlu1 %v844_v38, %s1664_s28  ;;  %1219 = vrot.lane.b32.xlu0 %v1194_v24, %s1664_s28  ;;  %v2086_v49 = vsel %vm299_vm7, %v1008_v34, %v998_v39  ;;  %v607_v34 = vcombine.high %v1866_v2, %v1869_v4  ;;  %v490_v24 = vrot.slane %v482_v62, %v1839_v51  ;;  %v1669_v44 = vmov 0  }
  0xd9   : > { %v194_v2 = vcombine.high %v1771_v3, %v1769_v1  ;;  %v210_v4 = vcombine.high %v1778_v12, %v1775_v8  ;;  %v736_v48 = vrot.slane %v722_v36, %v1839_v51  ;;  %v385_v39 = vcombine.high %v375_v28, %v1656_v0  ;;  %1556 = vset.pattern.permute.xlu1 %v1669_v44 }
  0xda   : > { %v621_v29 = vrot.slane %v607_v34, %v1839_v51  ;;  %v500_v8 = vcombine.high %v490_v24, %v1656_v0  ;;  %v386_v45 = vcombine.high %v382_v13, %v1656_v0  ;;  %1557 = vset.pattern.permute.xlu0 %v1669_v44 }
  0xdb   : > { %v208_v62 = vrot.slane %v194_v2, %v1820_v40  ;;  %v224_v38 = vrot.slane %v210_v4, %v1820_v40  ;;  %v740_v25 = vcombine.high %v736_v48, %v1656_v0  ;;  %v497_v40 = vrot.slane %v483_v63, %v1839_v51  ;;  %v2214_v63 = vpop.permute.xlu0 %262 }
  0xdc   : > { %1112 = vrot.lane.b32.xlu1 %v1086_v43, %s1666_s4  ;;  %746 = vrot.lane.b32.xlu0 %v720_v55, %s1662_s24  ;;  %v625_v1 = vcombine.high %v621_v29, %v1656_v0 }
  0xdd   : > { %v241_v3 = vcombine.low %v208_v62, %v224_v38  ;;  %v242_v43 = vcombine.high %v208_v62, %v224_v38  ;;  %v501_v61 = vcombine.high %v497_v40, %v1656_v0 }
  0xdf   : > { %v249_v12 = vrot.slane %v241_v3, %v1839_v51  ;;  %v256_v59 = vrot.slane %v242_v43, %v1839_v51  ;;  %v1002_v46 = vpop.permute.xlu0 %1001 }
  0xe0   : > { %877 = vrot.lane.b32.xlu1 %v851_v42, %s1666_s4  ;;  %1227 = vrot.lane.b32.xlu0 %v1201_v32, %s1666_s4 }
  0xe1   : > { %v259_v35 = vcombine.high %v249_v12, %v1656_v0  ;;  %v260_v10 = vcombine.high %v256_v59, %v1656_v0 }
  0xe4   : > { %857 = vrot.lane.b32.xlu1 %v852_v52, %s1661_s21  ;;  %754 = vrot.lane.b32.xlu0 %v729_v16, %s1664_s28 }
  0xe8   : > { %1100 = vrot.lane.b32.xlu1 %v1088_v58, %s1663_s27  ;;  %1092 = vrot.lane.b32.xlu0 %v1087_v60, %s1661_s21 }
  0xec   : > { %865 = vrot.lane.b32.xlu1 %v853_v30, %s1663_s27  ;;  %1207 = vrot.lane.b32.xlu0 %v1202_v31, %s1661_s21 }
  0xf0   : > { %1108 = vrot.lane.b32.xlu1 %v1089_v37, %s1665_s29  ;;  %1215 = vrot.lane.b32.xlu0 %v1203_v53, %s1663_s27 }
  0xf4   : > { %873 = vrot.lane.b32.xlu1 %v854_v57, %s1665_s29  ;;  %742 = vrot.lane.b32.xlu0 %v737_v17, %s1661_s21  ;;  %s1358_s21 = sadd.s32 %s1638_s15, %s1447_s20  ;;  %s1670_s15 = smov [#allocation2]  }
  0xf5   : > { %s1448_s24 = sshll.u32 %s1358_s21, 7  ;;  %s1566_s7 = sshll.u32 %s1670_s15, 4  ;;  %s1567_s7 = int_to_ptr.vmem [resolvable:$false] %s1566_s7 }
  0xf6   : > { %s1568_s8 = scalar_lea.vmem %s1567_s7, 256 }
  0xf8   : > { %1116 = vrot.lane.b32.xlu1 %v1090_v11, %s1667_s5  ;;  %1223 = vrot.lane.b32.xlu0 %v1204_v18, %s1665_s29 }
  0xfc   : > { %1231 = vrot.lane.b32.xlu1 %v1205_v54, %s1667_s5  ;;  %750 = vrot.lane.b32.xlu0 %v738_v6, %s1663_s27 }
 0x100   : > { %881 = vrot.lane.b32.xlu1 %v855_v19, %s1667_s5  ;;  %758 = vrot.lane.b32.xlu0 %v739_v14, %s1665_s29 }
 0x104   : > { %515 = vrot.lane.b32.xlu1 %v490_v24, %s1664_s28  ;;  %400 = vrot.lane.b32.xlu0 %v375_v28, %s1664_s28 }
 0x108   : > { %762 = vrot.lane.b32.xlu1 %v736_v48, %s1666_s4  ;;  %647 = vrot.lane.b32.xlu0 %v621_v29, %s1666_s4 }
 0x10c   : > { %404 = vrot.lane.b32.xlu1 %v385_v39, %s1665_s29  ;;  %270 = vrot.lane.b32.xlu0 %v258_v9, %s1663_s27  ;;  %s177_s27 = scalar_lea.vmem [#allocation2], %s1441_s11 }
 0x110   : > { %651 = vrot.lane.b32.xlu1 %v625_v1, %s1667_s5  ;;  %519 = vrot.lane.b32.xlu0 %v500_v8, %s1665_s29 }
 0x114   : > { %274 = vrot.lane.b32.xlu1 %v249_v12, %s1664_s28  ;;  %766 = vrot.lane.b32.xlu0 %v740_v25, %s1667_s5  ;;  %s1362_s28 = sshll.u32 %s177_s27, 4  ;;  %s1363_s28 = int_to_ptr.vmem [resolvable:$true] %s1362_s28 }
 0x115   : > { %s1562_s6 = scalar_lea.vmem %s1363_s28, 128  ;;  %p1569_p2 = scmp.lt.s32.totalorder %s1363_s28, %s1567_s7 }
 0x116   : > { %p1563_p13 = scmp.ne.s32.totalorder %s1363_s28, %s1562_s6  ;;  %p1570_p4 = scmp.lt.s32.totalorder %s1568_s8, %s1562_s6 }
 0x118   : > { %523 = vrot.lane.b32.xlu1 %v497_v40, %s1666_s4  ;;  %408 = vrot.lane.b32.xlu0 %v382_v13, %s1666_s4  ;;  %p1564_p0 = pnand %p1563_p13, %p1742_p3  ;;  %p1571_p5 = por %p1570_p4, %p1569_p2 }
 0x11a   : > { %p1565_p1 = pneg %p1564_p0 }
 0x11c   : > { %412 = vrot.lane.b32.xlu1 %v386_v45, %s1667_s5  ;;  %278 = vrot.lane.b32.xlu0 %v259_v35, %s1665_s29  ;;  %p1572_p6 = pnand %p1571_p5, %p1565_p1 }
 0x120   : > { %282 = vrot.lane.b32.xlu1 %v256_v59, %s1666_s4  ;;  %527 = vrot.lane.b32.xlu0 %v501_v61, %s1667_s5  ;;  %v1010_v59 = vsel %vm301_vm9, %v2086_v49, %v1002_v46 }
 0x124   : > { %286 = vrot.lane.b32.xlu0 %v260_v10, %s1667_s5  ;;  %1262 = vperm.xlu1 %1556, %v1259_v26   ;;  %s2303_s5 = scalar_lea.hbm %s2352_s3, %s1448_s24 }
 0x132   : > { %v393_v51 = vpop.permute.xlu1 %392 }
 0x136   : > { %v389_v55 = vpop.permute.xlu1 %388 }
 0x137   : > { %v415_v56 = vsel %vm289_vm2, %v1962_v15, %v389_v55 }
 0x138   : > { %v416_v41 = vsel %vm291_vm3, %v415_v56, %v393_v51 }
 0x13a   : > { %v397_v42 = vpop.permute.xlu1 %396  ;;  %v508_v32 = vpop.permute.xlu0 %507 }
 0x13b   : > { %v2220_v50 = vsel %vm293_vm4, %v416_v41, %v397_v42 }
 0x13e   : > { %v1097_v52 = vpop.permute.xlu1 %1096  ;;  %v504_v16 = vpop.permute.xlu0 %503 }
 0x13f   : > { %v530_v58 = vsel %vm289_vm2, %v2013_v7, %v504_v16 }
 0x140   : > { %v531_v60 = vsel %vm291_vm3, %v530_v58, %v508_v32 }
 0x142   : > { %v862_v21 = vpop.permute.xlu1 %861  ;;  %v512_v30 = vpop.permute.xlu0 %511 }
 0x143   : > { %v2226_v31 = vsel %vm293_vm4, %v531_v60, %v512_v30 }
 0x146   : > { %v1105_v15 = vpop.permute.xlu1 %1104  ;;  %v1212_v37 = vpop.permute.xlu0 %1211 }
 0x14a   : > { %v870_v53 = vpop.permute.xlu1 %869  ;;  %v1220_v57 = vpop.permute.xlu0 %1219 }
 0x14e   : > { %v1113_v17 = vpop.permute.xlu1 %1112  ;;  %v747_v11 = vpop.permute.xlu0 %746 }
 0x152   : > { %v878_v18 = vpop.permute.xlu1 %877  ;;  %v1228_v54 = vpop.permute.xlu0 %1227 }
 0x156   : > { %v858_v6 = vpop.permute.xlu1 %857  ;;  %v755_v19 = vpop.permute.xlu0 %754 }
 0x157   : > { %v884_v56 = vsel %vm289_vm2, %v2101_v33, %v858_v6 }
 0x158   : > { %v885_v41 = vsel %vm291_vm3, %v884_v56, %v862_v21 }
 0x15a   : > { %v1101_v14 = vpop.permute.xlu1 %1100  ;;  %v1093_v34 = vpop.permute.xlu0 %1092 }
 0x15b   : > { %v1119_v7 = vsel %vm289_vm2, %v2111_v22, %v1093_v34 }
 0x15c   : > { %v1120_v28 = vsel %vm291_vm3, %v1119_v7, %v1097_v52 }
 0x15d   : > { %v1121_v48 = vsel %vm293_vm4, %v1120_v28, %v1101_v14  ;;  %v290_v28 = vsel %vm289_vm2, %v1902_v27, %v2214_v63 }
 0x15e   : > { %v866_v36 = vpop.permute.xlu1 %865  ;;  %v1208_v24 = vpop.permute.xlu0 %1207  ;;  %v1122_v9 = vsel %vm295_vm5, %v1121_v48, %v1105_v15 }
 0x15f   : > { %v1234_v4 = vsel %vm289_vm2, %v2120_v20, %v1208_v24  ;;  %v886_v46 = vsel %vm293_vm4, %v885_v41, %v866_v36 }
 0x160   : > { %v1235_v62 = vsel %vm291_vm3, %v1234_v4, %v1212_v37  ;;  %v887_v52 = vsel %vm295_vm5, %v886_v46, %v870_v53 }
 0x162   : > { %v1109_v29 = vpop.permute.xlu1 %1108  ;;  %v1216_v2 = vpop.permute.xlu0 %1215 }
 0x163   : > { %v1123_v1 = vsel %vm297_vm6, %v1122_v9, %v1109_v29  ;;  %v1236_v22 = vsel %vm293_vm4, %v1235_v62, %v1216_v2 }
 0x164   : > { %v1124_v8 = vsel %vm299_vm7, %v1123_v1, %v1113_v17  ;;  %v1237_v12 = vsel %vm295_vm5, %v1236_v22, %v1220_v57 }
 0x166   : > { %v874_v38 = vpop.permute.xlu1 %873  ;;  %v743_v39 = vpop.permute.xlu0 %742 }
 0x167   : > { %v769_v32 = vsel %vm289_vm2, %v2132_v5, %v743_v39  ;;  %v888_v60 = vsel %vm297_vm6, %v887_v52, %v874_v38 }
 0x168   : > { %v770_v30 = vsel %vm291_vm3, %v769_v32, %v747_v11  ;;  %v889_v33 = vsel %vm299_vm7, %v888_v60, %v878_v18 }
 0x16a   : > { %v1117_v3 = vpop.permute.xlu1 %1116  ;;  %v1224_v25 = vpop.permute.xlu0 %1223 }
 0x16b   : > { %v1125_v20 = vsel %vm301_vm9, %v1124_v8, %v1117_v3  ;;  %v1238_v40 = vsel %vm297_vm6, %v1237_v12, %v1224_v25 }
 0x16c   : > { %v1251_v13 = vrot.slane %v1125_v20, 4  ;;  %v1239_v45 = vsel %vm299_vm7, %v1238_v40, %v1228_v54  ;;  %v1258_v40 = vld [vmem:[%s2350_s1] sm:$0xff] }
 0x16e   : > { %v1232_v35 = vpop.permute.xlu1 %1231  ;;  %v751_v43 = vpop.permute.xlu0 %750  ;;  %v1257_v61 = vsel %vm1253_vm10, %v1010_v59, %v1251_v13 }
 0x16f   : > { %v1240_v44 = vsel %vm301_vm9, %v1239_v45, %v1232_v35  ;;  %v771_v15 = vsel %vm293_vm4, %v770_v30, %v751_v43 }
 0x170   : > { %1458 = vmatpush3.msk.msra.mxu0 %vm1253_vm10, %v1240_v44  ;;  %v772_v17 = vsel %vm295_vm5, %v771_v15, %v755_v19 }
 0x171   : > { %1459 = vmatprep.subr.mxu0 %v1656_v0 }
 0x172   : > { %v882_v10 = vpop.permute.xlu1 %881  ;;  %1460 = vmatpush3.msra.mxu0 %v1257_v61  ;;  %v759_v26 = vpop.permute.xlu0 %758 }
 0x173   : > { %1461 = vmatprep.subr.mxu0 %v1656_v0  ;;  %v890_v57 = vsel %vm301_vm9, %v889_v33, %v882_v10  ;;  %v773_v5 = vsel %vm297_vm6, %v772_v17, %v759_v26 }
 0x174   : > { %v1248_v54 = vrot.slane %v890_v57, 4 }
 0x176   : > { %v516_v51 = vpop.permute.xlu1 %515  ;;  %v401_v55 = vpop.permute.xlu0 %400 }
 0x177   : > { %v533_v2 = vsel %vm295_vm5, %v2226_v31, %v516_v51  ;;  %v418_v4 = vsel %vm295_vm5, %v2220_v50, %v401_v55 }
 0x17a   : > { %v763_v42 = vpop.permute.xlu1 %762  ;;  %v648_v49 = vpop.permute.xlu0 %647 }
 0x17b   : > { %v774_v53 = vsel %vm299_vm7, %v773_v5, %v763_v42  ;;  %v659_v36 = vsel %vm299_vm7, %v2071_v23, %v648_v49  ;;  %v292_v23 = vsel %vm291_vm3, %v290_v28, %v2212_v47 }
 0x17e   : > { %v405_v16 = vpop.permute.xlu1 %404  ;;  %v271_v58 = vpop.permute.xlu0 %270 }
 0x17f   : > { %v419_v48 = vsel %vm297_vm6, %v418_v4, %v405_v16  ;;  %v294_v39 = vsel %vm293_vm4, %v292_v23, %v271_v58 }
 0x182   : > { %v652_v21 = vpop.permute.xlu1 %651  ;;  %v520_v37 = vpop.permute.xlu0 %519 }
 0x183   : > { %v660_v29 = vsel %vm301_vm9, %v659_v36, %v652_v21  ;;  %v534_v9 = vsel %vm297_vm6, %v533_v2, %v520_v37 }
 0x184   : > { %v1245_v62 = vrot.slane %v660_v29, 4 }
 0x186   : > { %v275_v6 = vpop.permute.xlu1 %274  ;;  %v767_v14 = vpop.permute.xlu0 %766 }
 0x187   : > { %v775_v34 = vsel %vm301_vm9, %v774_v53, %v767_v14  ;;  %v296_v22 = vsel %vm295_vm5, %v294_v39, %v275_v6 }
 0x188   : > { %v1256_v11 = vsel %vm1253_vm10, %v775_v34, %v1248_v54 }
 0x189   : > { %1462 = vmatpush3.msra.mxu0 %v1256_v11 }
 0x18a   : > { %v524_v7 = vpop.permute.xlu1 %523  ;;  %v409_v18 = vpop.permute.xlu0 %408  ;;  %1463 = vmatprep.subr.mxu0 %v1656_v0 }
 0x18b   : > { %v535_v38 = vsel %vm299_vm7, %v534_v9, %v524_v7  ;;  %v420_v27 = vsel %vm299_vm7, %v419_v48, %v409_v18 }
 0x18e   : > { %v413_v19 = vpop.permute.xlu1 %412  ;;  %v279_v24 = vpop.permute.xlu0 %278 }
 0x18f   : > { %v421_v31 = vsel %vm301_vm9, %v420_v27, %v413_v19  ;;  %v298_v47 = vsel %vm297_vm6, %v296_v22, %v279_v24 }
 0x190   : > { %v1242_v8 = vrot.slane %v421_v31, 4 }
 0x192   : > { %v528_v63 = vpop.permute.xlu0 %527  ;;  %v283_v1 = vpop.permute.xlu1 %282 }
 0x193   : > { %v536_v50 = vsel %vm301_vm9, %v535_v38, %v528_v63  ;;  %v300_v12 = vsel %vm299_vm7, %v298_v47, %v283_v1 }
 0x194   : > { %v1255_v3 = vsel %vm1253_vm10, %v536_v50, %v1245_v62 }
 0x195   : > { %1464 = vmatpush3.msra.mxu0 %v1255_v3 }
 0x196   : > { %v287_v25 = vpop.permute.xlu0 %286  ;;  %1465 = vmatprep.subr.mxu0 %v1656_v0 }
 0x197   : > { %v302_v20 = vsel %vm301_vm9, %v300_v12, %v287_v25 }
 0x198   : > { %v1254_v13 = vsel %vm1253_vm10, %v302_v20, %v1242_v8 }
 0x199   : > { %1466 = vmatpush3.msra.mxu0 %v1254_v13 }
 0x19a   : > { %1468 = vmatmul.mubr.msk.f32.vlgmr.msra.gmra.mxu0 %vm1265_vm11, %v1258_v40 }
 0x19f   : > { %v1263_v35 = vpop.permute.xlu1 %1262 }
 0x25a   : > { %v1338_v43 = vpop.f32.mrf.mxu0 }
 0x25b   : > { %v1339_v45 = vadd.f32 %v1338_v43, %v1263_v35 }
 0x25c   : > { %v1469_v0 = vpop.f32.mrf.mxu0 }
 0x25d   : > { %vm1342_vm12 = vcmp.gt.f32.partialorder %v1339_v45, 0.0  ;;  %v1343_v44 = vmul.f32 0.2, %v1339_v45 }
 0x25f   : > { %v1344_v59 = vsel %vm1342_vm12, %v1339_v45, %v1343_v44 }
 0x260   : > { %1345 = vst [vmem:[%s177_s27] sm:$0xff] %v1344_v59 }
 0x261   : > { %1575 = shalt.err (!%p1572_p6)
}
 0x262   : > { %s1576_s9 = scalar_lea.hbm %s2303_s5, 128  ;;  %s1580_s20 = scalar_lea.hbm %s2352_s3, 512 }
 0x263   : > { %p1577_p7 = scmp.ne.s32.totalorder %s2303_s5, %s1576_s9  ;;  %p1581_p11 = scmp.lt.s32.totalorder %s2303_s5, %s2352_s3 }
 0x264   : > { %p1582_p12 = scmp.lt.s32.totalorder %s1580_s20, %s1576_s9 }
 0x265   : > { %p1578_p9 = pnand %p1577_p7, %p1742_p3 }
 0x266   : > { %p1583_p13 = por %p1582_p12, %p1581_p11 }
 0x267   : > { %p1579_p10 = pneg %p1578_p9 }
 0x269   : > { %p1584_p0 = pnand %p1583_p13, %p1579_p10 }
 0x26b   : > { %1587 = shalt.err (!%p1584_p0)
}
 0x26c   : > { %1471 = dma.vmem_to_hbm [thread:$0]  (%p1742_p3), %s1363_s28, 128, %s2303_s5, %s1347_s16  }
 0x26d PF: > { %p1477_p1 = scmp.ge.s32.totalorder %s1654_s19, 2  ;;  %s1374_s27 = sand.u32 1, %s1626_s12  }
 0x26e   : > { %s1375_s29 = scalar_lea.sflag [#allocation3], %s1374_s27 }
 0x26f   : > { %p1474_p2 = pnand %p1477_p1, %p1751_p8 }
 0x271   : > { %p1475_p4 = pneg %p1474_p2 }
 0x273   : > { %1621 = dma.done.wait (%p1475_p4), %s1375_s29, 128  }
 0x274   : > { %1623 = vsyncadd (%p1475_p4), %s1375_s29, 4294967168  ;;  %s16_s19 = sadd.s32 1, %s1654_s19   ;;  %s2355_s12 = smov %s1630_s13 }
 0x275   : > { %p13_p5 = scmp.ge.s32.totalorder %s16_s19, 6   ;;  %s2356_s13 = smov %s1634_s14 }
 0x276   : > { %s2357_s14 = smov %s1760_s30  ;;  %s2358_s15 = smov %s1646_s17 }
 0x277   : > { %s2359_s16 = smov %s1650_s18  ;;  %s2360_s17 = smov %s2363_s22 }
 0x278   : > { %s2361_s18 = smov %s2367_s23  ;;  %15 = sbr.rel (!%p13_p5) target bundleno = 5 (0x5), region = 68 }
 0x27d   :  { %1380 = vsyncpa [#allocation3], 1 }
 0x27e   :  { %1382 = vsyncpa [#allocation3 + $0x1], 1 }

</bundles_post_ra>
